<compile_context>
chip_gen: v7x
topology: tpu7x:2x2x1
jax: 0.10.0
libtpu: 0.0.40
codegen_flags: <defaults>
</compile_context>

<pallas_src>
import functools

import jax
import jax.numpy as jnp
from jax.experimental import pallas as pl
from jax.experimental.pallas import tpu as pltpu

HIGHEST = jax.lax.Precision.HIGHEST


def _lstm_step_kernel(num_layers, hid, *refs):
    # Inputs (per grid step over K):
    #   state(B, L*2*hid) f32 [resident], q(B, TK) bf16 [tiled over K],
    #   xs(B, 2) f32 [resident], wq(TK, 4*hid) bf16 [tiled over K],
    #   ws(2, 4*hid) f32, whh(L*hid, 4*hid) bf16, b(L, 4*hid) f32,
    #   [wih((L-1)*hid, 4*hid) bf16   -- only if L > 1]
    # Output: out(B, L*2*hid) f32, written once on the last grid step.
    # Scratch: acc(B, 4*hid) f32 accumulator for the Q contribution.
    state_ref, q_ref, xs_ref, wq_ref, ws_ref, whh_ref, b_ref = refs[:7]
    if num_layers > 1:
        wih_ref, out_ref, acc_ref = refs[7], refs[8], refs[9]
    else:
        wih_ref = None
        out_ref, acc_ref = refs[7], refs[8]

    k = pl.program_id(0)

    @pl.when(k == 0)
    def _():
        acc_ref[...] = jnp.zeros_like(acc_ref)

    # Pipelined partial product of the (folded) Q-embedding matmul.
    acc_ref[...] += jnp.dot(q_ref[...], wq_ref[...],
                            preferred_element_type=jnp.float32)

    @pl.when(k == pl.num_programs(0) - 1)
    def _():
        xs = xs_ref[...]                      # (B, 2) = [m | cqi], f32
        ws = ws_ref[...]                      # (2, 4*hid), f32
        # K=2 "matmul" as a VPU broadcast-FMA (no MXU push/drain).
        in_contrib = (acc_ref[...]
                      + xs[:, 0:1] * ws[0:1, :]
                      + xs[:, 1:2] * ws[1:2, :])

        parts = []
        h_new = None
        for i in range(num_layers):
            h_prev = state_ref[:, 2 * hid * i: 2 * hid * i + hid]
            c_prev = state_ref[:, 2 * hid * i + hid: 2 * hid * (i + 1)]
            if i > 0:
                in_contrib = jnp.dot(h_new.astype(jnp.bfloat16),
                                     wih_ref[(i - 1) * hid: i * hid, :],
                                     preferred_element_type=jnp.float32)
            gates = (in_contrib
                     + jnp.dot(h_prev.astype(jnp.bfloat16),
                               whh_ref[i * hid:(i + 1) * hid, :],
                               preferred_element_type=jnp.float32)
                     + b_ref[i:i + 1, :])

            # Two full-width EUP passes (sigmoid covers i/f/o, tanh covers g), then slice.
            sig = jax.nn.sigmoid(gates)
            tnh = jnp.tanh(gates)
            i_g = sig[:, 0:hid]
            f_g = sig[:, hid:2 * hid]
            g_g = tnh[:, 2 * hid:3 * hid]
            o_g = sig[:, 3 * hid:4 * hid]

            c_new = f_g * c_prev + i_g * g_g
            h_new = o_g * jnp.tanh(c_new)
            parts.append(h_new)
            parts.append(c_new)

        # Single lane-dense store of the whole packed state (no masked sub-stores).
        out_ref[...] = jnp.concatenate(parts, axis=-1)


def prepare_kernel_params(params, *, num_layers, hid):
    """One-time host-side fusion of PyTorch-layout params into kernel operands."""
    wq_t = params['wq_t'].astype(jnp.float32)                # (Qin, hid), rows interleaved (re, im)
    # Row-permute so Q can be fed as a [real | imag] concat (no interleave shuffle).
    wq_perm = jnp.concatenate([wq_t[0::2], wq_t[1::2]], axis=0)
    wih0 = params['layers'][0]['wih_t'].astype(jnp.float32)  # (hid, 4*hid)

    wq_fused = jnp.dot(wq_perm, wih0, precision=HIGHEST).astype(jnp.bfloat16)   # (Qin, 4*hid)
    ws = jnp.concatenate([params['wm_t'], params['wcqi_t']], axis=0)            # (2, hid): [m; cqi]
    ws_fused = jnp.dot(ws.astype(jnp.float32), wih0, precision=HIGHEST).astype(jnp.float32)

    b_emb = (params['bq'] + params['bcqi'] + params['bm']).astype(jnp.float32)  # (1, hid)
    b_rows = [jnp.dot(b_emb, wih0, precision=HIGHEST)[0]
              + params['layers'][0]['b_ih'] + params['layers'][0]['b_hh']]
    for i in range(1, num_layers):
        lp = params['layers'][i]
        b_rows.append(lp['b_ih'] + lp['b_hh'])
    b_pk = jnp.stack(b_rows, axis=0).astype(jnp.float32)     # (L, 4*hid)

    whh_pk = jnp.concatenate([lp['whh_t'] for lp in params['layers']],
                             axis=0).astype(jnp.bfloat16)    # (L*hid, 4*hid)
    kp = {'wq_fused': wq_fused, 'ws_fused': ws_fused, 'b': b_pk, 'whh': whh_pk}
    if num_layers > 1:
        kp['wih'] = jnp.concatenate(
            [params['layers'][i]['wih_t'] for i in range(1, num_layers)],
            axis=0).astype(jnp.bfloat16)                     # ((L-1)*hid, 4*hid)
    return kp


def lstm_cell_forward(Q, cqi, m, his_data, kparams, *, num_layers, hid, tk=512):
    """Matches LSTMCell.forward(Q, cqi, m, his_data) of the PyTorch module.

    his_data may be None, {'data': [(h, c), ...]}, or a previous output dict
    (whose padded 'packed' state is then consumed directly — the fast path).
    """
    B = Q.shape[0]
    B_pad = ((B + 7) // 8) * 8          # fill 8-sublane vregs / MXU rows
    state_w = num_layers * 2 * hid

    # torch.view_as_real(Q).reshape(B,-1) @ Wq^T  ==  [real|imag] @ Wq_perm (host fusion)
    q_cat = jnp.concatenate([jnp.real(Q), jnp.imag(Q)], axis=-1).astype(jnp.bfloat16)
    xs = jnp.stack([m.astype(jnp.float32), cqi.astype(jnp.float32)], axis=-1)  # (B, 2)

    if his_data is None:
        state = jnp.zeros((B_pad, state_w), jnp.float32)
    elif isinstance(his_data, dict) and his_data.get('packed', None) is not None:
        state = his_data['packed']      # already packed & padded: zero re-layout cost
    else:
        state = jnp.concatenate(
            [jnp.concatenate([h, c], axis=-1) for (h, c) in his_data['data']],
            axis=-1).astype(jnp.float32)
    if state.shape[0] != B_pad:
        state = jnp.pad(state, ((0, B_pad - state.shape[0]), (0, 0)))

    if B_pad != B:
        pad = ((0, B_pad - B), (0, 0))
        q_cat = jnp.pad(q_cat, pad)
        xs = jnp.pad(xs, pad)

    qin = q_cat.shape[1]
    tk = min(tk, qin)
    assert qin % tk == 0, "Q input width must be divisible by the K tile"
    n_k = qin // tk

    inputs = [state, q_cat, xs,
              kparams['wq_fused'], kparams['ws_fused'],
              kparams['whh'], kparams['b']]
    if num_layers > 1:
        inputs.append(kparams['wih'])

    const = lambda k: (0, 0)            # fetched once, VMEM-resident across the grid
    in_specs = [
        pl.BlockSpec((B_pad, state_w), const),                # packed (h, c) state
        pl.BlockSpec((B_pad, tk), lambda k: (0, k)),          # Q, tiled over the reduction
        pl.BlockSpec((B_pad, 2), const),                      # [m | cqi]
        pl.BlockSpec((tk, 4 * hid), lambda k: (k, 0)),        # fused Q weight, tiled over K
        pl.BlockSpec((2, 4 * hid), const),                    # fused scalar-embedding rows
        pl.BlockSpec((num_layers * hid, 4 * hid), const),     # W_hh stack
        pl.BlockSpec((num_layers, 4 * hid), const),           # per-layer bias rows
    ]
    if num_layers > 1:
        in_specs.append(pl.BlockSpec(((num_layers - 1) * hid, 4 * hid), const))

    kernel = functools.partial(_lstm_step_kernel, num_layers, hid)
    out = pl.pallas_call(
        kernel,
        out_shape=jax.ShapeDtypeStruct((B_pad, state_w), jnp.float32),
        grid_spec=pltpu.PrefetchScalarGridSpec(
            num_scalar_prefetch=0,
            grid=(n_k,),
            in_specs=in_specs,
            out_specs=pl.BlockSpec((B_pad, state_w), const),
            scratch_shapes=[pltpu.VMEM((B_pad, 4 * hid), jnp.float32)]),
        compiler_params=pltpu.CompilerParams(
            dimension_semantics=("arbitrary",)),
        input_output_aliases={0: 0},    # packed state updates in place when donated
    )(*inputs)

    out_b = out[:B]
    cur_data = [(out_b[:, 2 * hid * i: 2 * hid * i + hid],
                 out_b[:, 2 * hid * i + hid: 2 * hid * (i + 1)])
                for i in range(num_layers)]
    h_last = cur_data[-1][0]
    return {'data': cur_data, 'Q_feature': h_last, 'H_feature': h_last,
            'packed': out}


def reference_forward(Q, cqi, m, his_data, params, *, num_layers, hid):
    """Pure-JAX f32 reference mirroring the PyTorch module (for tolerance checks)."""
    B = Q.shape[0]
    # torch.view_as_real(Q).reshape(B, -1): interleaved [re0, im0, re1, im1, ...]
    q_ri = jnp.stack([jnp.real(Q), jnp.imag(Q)], axis=-1).reshape(B, -1)
    x = (jnp.dot(q_ri, params['wq_t'], precision=HIGHEST) + params['bq']
         + cqi[:, None] * params['wcqi_t'][0] + params['bcqi']
         + m[:, None] * params['wm_t'][0] + params['bm'])
    his = [None] * num_layers if his_data is None else his_data['data']
    cur = []
    h = x
    for i in range(num_layers):
        lp = params['layers'][i]
        if his[i] is None:
            h_prev = jnp.zeros((B, hid), jnp.float32)
            c_prev = jnp.zeros((B, hid), jnp.float32)
        else:
            h_prev, c_prev = his[i]
        gates = (jnp.dot(h, lp['wih_t'], precision=HIGHEST) + lp['b_ih']
                 + jnp.dot(h_prev, lp['whh_t'], precision=HIGHEST) + lp['b_hh'])
        i_g = jax.nn.sigmoid(gates[:, 0:hid])
        f_g = jax.nn.sigmoid(gates[:, hid:2 * hid])
        g_g = jnp.tanh(gates[:, 2 * hid:3 * hid])
        o_g = jax.nn.sigmoid(gates[:, 3 * hid:4 * hid])
        c_new = f_g * c_prev + i_g * g_g
        h = o_g * jnp.tanh(c_new)
        cur.append((h, c_new))
    return {'data': cur, 'Q_feature': h, 'H_feature': h}


def init_params(key, hid, num_layers, q_inp):
    """Deterministic synthetic parameter init (shapes mirror the PyTorch module)."""
    ks = jax.random.split(key, 6 + 4 * num_layers)

    def uni(k, shape, fan_in):
        bound = 1.0 / jnp.sqrt(jnp.float32(fan_in))
        return jax.random.uniform(k, shape, jnp.float32, -bound, bound)

    params = {
        # nn.Linear(q_inp, hid): weight (hid, q_inp) -> stored transposed (q_inp, hid)
        'wq_t':   uni(ks[0], (q_inp, hid), q_inp),
        'bq':     uni(ks[1], (1, hid), q_inp),
        # nn.Linear(1, hid): weight (hid, 1) -> stored transposed (1, hid)
        'wcqi_t': uni(ks[2], (1, hid), 1),
        'bcqi':   uni(ks[3], (1, hid), 1),
        'wm_t':   uni(ks[4], (1, hid), 1),
        'bm':     uni(ks[5], (1, hid), 1),
        'layers': [],
    }
    for i in range(num_layers):
        k0, k1, k2, k3 = ks[6 + 4 * i: 6 + 4 * (i + 1)]
        params['layers'].append({
            # nn.LSTMCell: weight_ih (4*hid, hid) -> transposed (hid, 4*hid)
            'wih_t': uni(k0, (hid, 4 * hid), hid),
            'whh_t': uni(k1, (hid, 4 * hid), hid),
            'b_ih':  uni(k2, (4 * hid,), hid),
            'b_hh':  uni(k3, (4 * hid,), hid),
        })
    return params


if __name__ == "__main__":
    B = 4                  # deliberately not a multiple of 8: exercises sublane padding
    HID = 32
    NUM_LAYERS = 2
    Q_INP = 32 * 32 * 2    # fixed by the module: LSTMEmb(hid, 32*32*2)

    key = jax.random.PRNGKey(0)
    k_qr, k_qi, k_cqi, k_m, k_p = jax.random.split(key, 5)

    Q = (jax.random.normal(k_qr, (B, 32 * 32), jnp.float32)
         + 1j * jax.random.normal(k_qi, (B, 32 * 32), jnp.float32))   # complex64
    cqi = jax.random.normal(k_cqi, (B,), jnp.float32)
    m = jax.random.normal(k_m, (B,), jnp.float32)

    params = init_params(k_p, HID, NUM_LAYERS, Q_INP)
    kparams = prepare_kernel_params(params, num_layers=NUM_LAYERS, hid=HID)

    fwd = jax.jit(functools.partial(lstm_cell_forward,
                                    num_layers=NUM_LAYERS, hid=HID))

    # step 1 (no history) and step 2 (recurrent, packed-state fast path)
    out = fwd(Q, cqi, m, None, kparams)
    jax.block_until_ready(out)
    out2 = fwd(Q, cqi, m, out, kparams)
    jax.block_until_ready(out2)

    # numerical check vs. a pure-JAX f32 reference of the torch module
    ref1 = reference_forward(Q, cqi, m, None, params, num_layers=NUM_LAYERS, hid=HID)
    ref2 = reference_forward(Q, cqi, m, ref1, params, num_layers=NUM_LAYERS, hid=HID)

    def max_err(a, b):
        return float(jnp.max(jnp.abs(a - b)))

    TOL = 3e-2   # bf16 MXU operands / bf16-rounded fused weight vs f32 reference
    assert len(out['data']) == NUM_LAYERS
    assert out['Q_feature'].shape == (B, HID) and out['H_feature'].shape == (B, HID)
    for (h_k, c_k), (h_r, c_r) in zip(out['data'], ref1['data']):
        assert h_k.shape == (B, HID) and c_k.shape == (B, HID)
        assert max_err(h_k, h_r) < TOL, max_err(h_k, h_r)
        assert max_err(c_k, c_r) < TOL, max_err(c_k, c_r)
    for (h_k, c_k), (h_r, c_r) in zip(out2['data'], ref2['data']):
        assert max_err(h_k, h_r) < TOL, max_err(h_k, h_r)
        assert max_err(c_k, c_r) < TOL, max_err(c_k, c_r)
    assert max_err(out2['Q_feature'], ref2['Q_feature']) < TOL

    print("KERNEL_OK")
</pallas_src>

<mosaic_0001>
module attributes {stable_mosaic.version = 11 : i64} {
  func.func @_lstm_step_kernel(%arg0: i32, %arg1: memref<8x128xf32, #tpu.memory_space<vmem>>, %arg2: memref<8x512xbf16, #tpu.memory_space<vmem>>, %arg3: memref<8x2xf32, #tpu.memory_space<vmem>>, %arg4: memref<512x128xbf16, #tpu.memory_space<vmem>>, %arg5: memref<2x128xf32, #tpu.memory_space<vmem>>, %arg6: memref<64x128xbf16, #tpu.memory_space<vmem>>, %arg7: memref<2x128xf32, #tpu.memory_space<vmem>>, %arg8: memref<32x128xbf16, #tpu.memory_space<vmem>>, %arg9: memref<8x128xf32, #tpu.memory_space<vmem>>, %arg10: memref<8x128xf32, #tpu.memory_space<vmem>>) attributes {dimension_semantics = [#tpu.dimension_semantics<arbitrary>], iteration_bounds = array<i64: 4>, scalar_prefetch = 0 : i64, scratch_operands = 1 : i64, tpu.core_type = #tpu.core_type<tc>, window_params = [{pipeline_mode = #tpu.pipeline_mode<synchronous>, transform_indices = @transform_0, window_bounds = array<i64: 8, 128>}, {transform_indices = @transform_1, window_bounds = array<i64: 8, 512>}, {pipeline_mode = #tpu.pipeline_mode<synchronous>, transform_indices = @transform_2, window_bounds = array<i64: 8, 2>}, {transform_indices = @transform_3, window_bounds = array<i64: 512, 128>}, {pipeline_mode = #tpu.pipeline_mode<synchronous>, transform_indices = @transform_4, window_bounds = array<i64: 2, 128>}, {pipeline_mode = #tpu.pipeline_mode<synchronous>, transform_indices = @transform_5, window_bounds = array<i64: 64, 128>}, {pipeline_mode = #tpu.pipeline_mode<synchronous>, transform_indices = @transform_6, window_bounds = array<i64: 2, 128>}, {pipeline_mode = #tpu.pipeline_mode<synchronous>, transform_indices = @transform_7, window_bounds = array<i64: 32, 128>}, {pipeline_mode = #tpu.pipeline_mode<synchronous>, transform_indices = @transform_8, window_bounds = array<i64: 8, 128>}]} {
    %c0_i32 = arith.constant 0 : i32
    %0 = arith.cmpi eq, %arg0, %c0_i32 : i32
    %1 = arith.extui %0 : i1 to i32
    %c0_i32_0 = arith.constant 0 : i32
    %2 = arith.cmpi ne, %1, %c0_i32_0 : i32
    scf.if %2 {
      %cst_9 = arith.constant 0.000000e+00 : f32
      %12 = vector.broadcast %cst_9 : f32 to vector<8x128xf32>
      %c0_10 = arith.constant 0 : index
      %c0_11 = arith.constant 0 : index
      %13 = vector.load %arg10[%c0_10, %c0_11] : memref<8x128xf32, #tpu.memory_space<vmem>>, vector<8x128xf32>
      tpu.vector_store %arg10[%c0_10, %c0_11], %12 {strides = array<i32>} : memref<8x128xf32, #tpu.memory_space<vmem>>, vector<8x128xf32>,
    } else {
    }
    %c0 = arith.constant 0 : index
    %c0_1 = arith.constant 0 : index
    %3 = vector.load %arg10[%c0, %c0_1] : memref<8x128xf32, #tpu.memory_space<vmem>>, vector<8x128xf32>
    %c0_2 = arith.constant 0 : index
    %c0_3 = arith.constant 0 : index
    %4 = vector.load %arg2[%c0_2, %c0_3] : memref<8x512xbf16, #tpu.memory_space<vmem>>, vector<8x512xbf16>
    %c0_4 = arith.constant 0 : index
    %c0_5 = arith.constant 0 : index
    %5 = vector.load %arg4[%c0_4, %c0_5] : memref<512x128xbf16, #tpu.memory_space<vmem>>, vector<512x128xbf16>
    %cst = arith.constant dense<0.000000e+00> : vector<8x128xf32>
    %6 = tpu.matmul %4, %5, %cst {dimension_numbers = #tpu.dot_dimension_numbers<[1], [0], [0], [1], [0, 0, 1, 1], [], []>} : vector<8x512xbf16>, vector<512x128xbf16>, vector<8x128xf32> -> vector<8x128xf32>
    %7 = arith.addf %3, %6 : vector<8x128xf32>
    %c0_6 = arith.constant 0 : index
    %c0_7 = arith.constant 0 : index
    %8 = vector.load %arg10[%c0_6, %c0_7] : memref<8x128xf32, #tpu.memory_space<vmem>>, vector<8x128xf32>
    tpu.vector_store %arg10[%c0_6, %c0_7], %7 {strides = array<i32>} : memref<8x128xf32, #tpu.memory_space<vmem>>, vector<8x128xf32>,
    %c3_i32 = arith.constant 3 : i32
    %9 = arith.cmpi eq, %arg0, %c3_i32 : i32
    %10 = arith.extui %9 : i1 to i32
    %c0_i32_8 = arith.constant 0 : i32
    %11 = arith.cmpi ne, %10, %c0_i32_8 : i32
    scf.if %11 {
      %c0_9 = arith.constant 0 : index
      %c0_10 = arith.constant 0 : index
      %12 = vector.load %arg3[%c0_9, %c0_10] : memref<8x2xf32, #tpu.memory_space<vmem>>, vector<8x2xf32>
      %c0_11 = arith.constant 0 : index
      %c0_12 = arith.constant 0 : index
      %13 = vector.load %arg5[%c0_11, %c0_12] : memref<2x128xf32, #tpu.memory_space<vmem>>, vector<2x128xf32>
      %c0_13 = arith.constant 0 : index
      %c0_14 = arith.constant 0 : index
      %14 = vector.load %arg10[%c0_13, %c0_14] : memref<8x128xf32, #tpu.memory_space<vmem>>, vector<8x128xf32>
      %15 = vector.extract_strided_slice %12 {offsets = [0, 0], sizes = [8, 1], strides = [1, 1]} : vector<8x2xf32> to vector<8x1xf32>
      %16 = vector.extract_strided_slice %13 {offsets = [0, 0], sizes = [1, 128], strides = [1, 1]} : vector<2x128xf32> to vector<1x128xf32>
      %17 = vector.broadcast %15 : vector<8x1xf32> to vector<8x128xf32>
      %18 = vector.broadcast %16 : vector<1x128xf32> to vector<8x128xf32>
      %19 = arith.mulf %17, %18 : vector<8x128xf32>
      %20 = arith.addf %14, %19 : vector<8x128xf32>
      %21 = vector.extract_strided_slice %12 {offsets = [0, 1], sizes = [8, 1], strides = [1, 1]} : vector<8x2xf32> to vector<8x1xf32>
      %22 = vector.extract_strided_slice %13 {offsets = [1, 0], sizes = [1, 128], strides = [1, 1]} : vector<2x128xf32> to vector<1x128xf32>
      %23 = vector.broadcast %21 : vector<8x1xf32> to vector<8x128xf32>
      %24 = vector.broadcast %22 : vector<1x128xf32> to vector<8x128xf32>
      %25 = arith.mulf %23, %24 : vector<8x128xf32>
      %26 = arith.addf %20, %25 : vector<8x128xf32>
      %c0_15 = arith.constant 0 : index
      %c0_16 = arith.constant 0 : index
      %27 = vector.load %arg1[%c0_15, %c0_16] : memref<8x128xf32, #tpu.memory_space<vmem>>, vector<8x32xf32>
      %c0_17 = arith.constant 0 : index
      %c32 = arith.constant 32 : index
      %28 = vector.load %arg1[%c0_17, %c32] : memref<8x128xf32, #tpu.memory_space<vmem>>, vector<8x32xf32>
      %29 = arith.truncf %27 : vector<8x32xf32> to vector<8x32xbf16>
      %c0_18 = arith.constant 0 : index
      %c0_19 = arith.constant 0 : index
      %30 = vector.load %arg6[%c0_18, %c0_19] : memref<64x128xbf16, #tpu.memory_space<vmem>>, vector<32x128xbf16>
      %cst_20 = arith.constant dense<0.000000e+00> : vector<8x128xf32>
      %31 = tpu.matmul %29, %30, %cst_20 {dimension_numbers = #tpu.dot_dimension_numbers<[1], [0], [0], [1], [0, 0, 1, 1], [], []>} : vector<8x32xbf16>, vector<32x128xbf16>, vector<8x128xf32> -> vector<8x128xf32>
      %32 = arith.addf %26, %31 : vector<8x128xf32>
      %c0_21 = arith.constant 0 : index
      %c0_22 = arith.constant 0 : index
      %33 = vector.load %arg7[%c0_21, %c0_22] : memref<2x128xf32, #tpu.memory_space<vmem>>, vector<1x128xf32>
      %34 = vector.broadcast %33 : vector<1x128xf32> to vector<8x128xf32>
      %35 = arith.addf %32, %34 : vector<8x128xf32>
      %36 = arith.negf %35 : vector<8x128xf32>
      %37 = math.exp %36 : vector<8x128xf32>
      %cst_23 = arith.constant 1.000000e+00 : f32
      %38 = vector.broadcast %cst_23 : f32 to vector<8x128xf32>
      %39 = arith.addf %38, %37 : vector<8x128xf32>
      %40 = arith.divf %38, %39 : vector<8x128xf32>
      %41 = math.tanh %35 : vector<8x128xf32>
      %42 = vector.extract_strided_slice %40 {offsets = [0, 0], sizes = [8, 32], strides = [1, 1]} : vector<8x128xf32> to vector<8x32xf32>
      %43 = vector.extract_strided_slice %40 {offsets = [0, 32], sizes = [8, 32], strides = [1, 1]} : vector<8x128xf32> to vector<8x32xf32>
      %44 = vector.extract_strided_slice %41 {offsets = [0, 64], sizes = [8, 32], strides = [1, 1]} : vector<8x128xf32> to vector<8x32xf32>
      %45 = vector.extract_strided_slice %40 {offsets = [0, 96], sizes = [8, 32], strides = [1, 1]} : vector<8x128xf32> to vector<8x32xf32>
      %46 = arith.mulf %43, %28 : vector<8x32xf32>
      %47 = arith.mulf %42, %44 : vector<8x32xf32>
      %48 = arith.addf %46, %47 : vector<8x32xf32>
      %49 = math.tanh %48 : vector<8x32xf32>
      %50 = arith.mulf %45, %49 : vector<8x32xf32>
      %c0_24 = arith.constant 0 : index
      %c64 = arith.constant 64 : index
      %51 = vector.load %arg1[%c0_24, %c64] : memref<8x128xf32, #tpu.memory_space<vmem>>, vector<8x32xf32>
      %c0_25 = arith.constant 0 : index
      %c96 = arith.constant 96 : index
      %52 = vector.load %arg1[%c0_25, %c96] : memref<8x128xf32, #tpu.memory_space<vmem>>, vector<8x32xf32>
      %53 = arith.truncf %50 : vector<8x32xf32> to vector<8x32xbf16>
      %c0_26 = arith.constant 0 : index
      %c0_27 = arith.constant 0 : index
      %54 = vector.load %arg8[%c0_26, %c0_27] : memref<32x128xbf16, #tpu.memory_space<vmem>>, vector<32x128xbf16>
      %cst_28 = arith.constant dense<0.000000e+00> : vector<8x128xf32>
      %55 = tpu.matmul %53, %54, %cst_28 {dimension_numbers = #tpu.dot_dimension_numbers<[1], [0], [0], [1], [0, 0, 1, 1], [], []>} : vector<8x32xbf16>, vector<32x128xbf16>, vector<8x128xf32> -> vector<8x128xf32>
      %56 = arith.truncf %51 : vector<8x32xf32> to vector<8x32xbf16>
      %c32_29 = arith.constant 32 : index
      %c0_30 = arith.constant 0 : index
      %57 = vector.load %arg6[%c32_29, %c0_30] : memref<64x128xbf16, #tpu.memory_space<vmem>>, vector<32x128xbf16>
      %cst_31 = arith.constant dense<0.000000e+00> : vector<8x128xf32>
      %58 = tpu.matmul %56, %57, %cst_31 {dimension_numbers = #tpu.dot_dimension_numbers<[1], [0], [0], [1], [0, 0, 1, 1], [], []>} : vector<8x32xbf16>, vector<32x128xbf16>, vector<8x128xf32> -> vector<8x128xf32>
      %59 = arith.addf %55, %58 : vector<8x128xf32>
      %c1 = arith.constant 1 : index
      %c0_32 = arith.constant 0 : index
      %60 = vector.load %arg7[%c1, %c0_32] : memref<2x128xf32, #tpu.memory_space<vmem>>, vector<1x128xf32>
      %61 = vector.broadcast %60 : vector<1x128xf32> to vector<8x128xf32>
      %62 = arith.addf %59, %61 : vector<8x128xf32>
      %63 = arith.negf %62 : vector<8x128xf32>
      %64 = math.exp %63 : vector<8x128xf32>
      %cst_33 = arith.constant 1.000000e+00 : f32
      %65 = vector.broadcast %cst_33 : f32 to vector<8x128xf32>
      %66 = arith.addf %65, %64 : vector<8x128xf32>
      %67 = arith.divf %65, %66 : vector<8x128xf32>
      %68 = math.tanh %62 : vector<8x128xf32>
      %69 = vector.extract_strided_slice %67 {offsets = [0, 0], sizes = [8, 32], strides = [1, 1]} : vector<8x128xf32> to vector<8x32xf32>
      %70 = vector.extract_strided_slice %67 {offsets = [0, 32], sizes = [8, 32], strides = [1, 1]} : vector<8x128xf32> to vector<8x32xf32>
      %71 = vector.extract_strided_slice %68 {offsets = [0, 64], sizes = [8, 32], strides = [1, 1]} : vector<8x128xf32> to vector<8x32xf32>
      %72 = vector.extract_strided_slice %67 {offsets = [0, 96], sizes = [8, 32], strides = [1, 1]} : vector<8x128xf32> to vector<8x32xf32>
      %73 = arith.mulf %70, %52 : vector<8x32xf32>
      %74 = arith.mulf %69, %71 : vector<8x32xf32>
      %75 = arith.addf %73, %74 : vector<8x32xf32>
      %76 = math.tanh %75 : vector<8x32xf32>
      %77 = arith.mulf %72, %76 : vector<8x32xf32>
      %78 = tpu.concatenate %50, %48, %77, %75 in 1 : vector<8x32xf32>, vector<8x32xf32>, vector<8x32xf32>, vector<8x32xf32> -> vector<8x128xf32>
      %c0_34 = arith.constant 0 : index
      %c0_35 = arith.constant 0 : index
      %79 = vector.load %arg9[%c0_34, %c0_35] : memref<8x128xf32, #tpu.memory_space<vmem>>, vector<8x128xf32>
      tpu.vector_store %arg9[%c0_34, %c0_35], %78 {strides = array<i32>} : memref<8x128xf32, #tpu.memory_space<vmem>>, vector<8x128xf32>,
    } else {
    }
    return
  }
  func.func @transform_0(%arg0: i32) -> (i32, i32) {
    %c0_i32 = arith.constant 0 : i32
    %c0_i32_0 = arith.constant 0 : i32
    %c0_i32_1 = arith.constant 0 : i32
    return %c0_i32, %c0_i32_0 : i32, i32
  }
  func.func @transform_1(%arg0: i32) -> (i32, i32) {
    %c0_i32 = arith.constant 0 : i32
    %c0_i32_0 = arith.constant 0 : i32
    return %c0_i32, %arg0 : i32, i32
  }
  func.func @transform_2(%arg0: i32) -> (i32, i32) {
    %c0_i32 = arith.constant 0 : i32
    %c0_i32_0 = arith.constant 0 : i32
    %c0_i32_1 = arith.constant 0 : i32
    return %c0_i32, %c0_i32_0 : i32, i32
  }
  func.func @transform_3(%arg0: i32) -> (i32, i32) {
    %c0_i32 = arith.constant 0 : i32
    %c0_i32_0 = arith.constant 0 : i32
    return %arg0, %c0_i32 : i32, i32
  }
  func.func @transform_4(%arg0: i32) -> (i32, i32) {
    %c0_i32 = arith.constant 0 : i32
    %c0_i32_0 = arith.constant 0 : i32
    %c0_i32_1 = arith.constant 0 : i32
    return %c0_i32, %c0_i32_0 : i32, i32
  }
  func.func @transform_5(%arg0: i32) -> (i32, i32) {
    %c0_i32 = arith.constant 0 : i32
    %c0_i32_0 = arith.constant 0 : i32
    %c0_i32_1 = arith.constant 0 : i32
    return %c0_i32, %c0_i32_0 : i32, i32
  }
  func.func @transform_6(%arg0: i32) -> (i32, i32) {
    %c0_i32 = arith.constant 0 : i32
    %c0_i32_0 = arith.constant 0 : i32
    %c0_i32_1 = arith.constant 0 : i32
    return %c0_i32, %c0_i32_0 : i32, i32
  }
  func.func @transform_7(%arg0: i32) -> (i32, i32) {
    %c0_i32 = arith.constant 0 : i32
    %c0_i32_0 = arith.constant 0 : i32
    %c0_i32_1 = arith.constant 0 : i32
    return %c0_i32, %c0_i32_0 : i32, i32
  }
  func.func @transform_8(%arg0: i32) -> (i32, i32) {
    %c0_i32 = arith.constant 0 : i32
    %c0_i32_0 = arith.constant 0 : i32
    %c0_i32_1 = arith.constant 0 : i32
    return %c0_i32, %c0_i32_0 : i32, i32
  }
}

</mosaic_0001>

<bundles_post_ra>
// kernel: custom-call.1
= control target key start
LH: loop header
LB: loop body
LE: loop exit
PB: predicated region body
PF: predicated region fallthrough
CT: control target
= control target key end

     0   :  { %s59_s0 = inlined_call_operand.hbm [shape: c64[4,1024], index: 0, kind: input, shape index: {}]   ;;  %s60_s1 = inlined_call_operand.vmem [shape: f32[4,1024], index: 1, kind: output, shape index: {}]  }
   0x1   :  { %s2_s8 = scalar_lea.hbm %s59_s0, 512 }
   0x2   :  { %3 = vsyncpa [#allocation0], 0  ;;  %s4_s11 = sshll.u32 %s60_s1, 4  ;;  %s34_s14 = scalar_lea.hbm %s59_s0, 1024  ;;  %s5_s11 = int_to_ptr.vmem [resolvable:$true] %s4_s11 }
   0x3   :  { %p11_p0 = scmp.ne.s32.totalorder %s2_s8, %s34_s14  ;;  %p13_p1 = scmp.lt.u32.totalorder %s2_s8, %s59_s0 }
   0x4   :  { %p14_p2 = scmp.lt.u32.totalorder %s34_s14, %s34_s14  ;;  %p16_p4 = scmp.lt.u32.totalorder %s34_s14, %s2_s8 }
   0x6   :  { %p15_p3 = por %p14_p2, %p13_p1 }
   0x8   :  { %p17_p5 = por %p16_p4, %p15_p3 }
   0xa   :  { %p18_p6 = pnand %p17_p5, %p11_p0 }
   0xc   :  { %21 = shalt.err (!%p18_p6)  }
   0xd   :  { %s22_s17 = scalar_lea.vmem %s5_s11, 512  ;;  %p27_p8 = scmp.lt.s32.totalorder %s5_s11, %s5_s11 }
   0xe   :  { %p23_p7 = scmp.ne.s32.totalorder %s5_s11, %s22_s17  ;;  %p28_p9 = scmp.lt.s32.totalorder %s22_s17, %s22_s17 }
  0x10   :  { %p29_p10 = por %p28_p9, %p27_p8 }
  0x12   :  { %p30_p11 = pnand %p29_p10, %p23_p7 }
  0x14   :  { %33 = shalt.err (!%p30_p11)  }
  0x15   :  { %7 = dma.hbm_to_vmem [thread:$0]  %s2_s8, 512, %s5_s11, [#allocation0] }
  0x16   :  { %35 = dma.done.wait [#allocation0], 512  }
  0x17   :  { %36 = vsyncadd [#allocation0], 4294966784 }
  0x18   :  { %9 = vsyncpa [#allocation0], 1 }

// kernel: custom-call
= control target key start
LH: loop header
LB: loop body
LE: loop exit
PB: predicated region body
PF: predicated region fallthrough
CT: control target
= control target key end

     0   :  { %2 = vsyncpa [#allocation0], 0  ;;  %s61_s0 = inlined_call_operand.hbm [shape: c64[4,1024], index: 0, kind: input, shape index: {}]   ;;  %s62_s1 = inlined_call_operand.vmem [shape: f32[4,1024], index: 1, kind: output, shape index: {}]  }
   0x1   :  { %s3_s8 = sshll.u32 %s62_s1, 4  ;;  %s9_s11 = scalar_lea.hbm %s61_s0, 512  ;;  %s4_s8 = int_to_ptr.vmem [resolvable:$true] %s3_s8 }
   0x2   :  { %p10_p0 = scmp.ne.s32.totalorder %s61_s0, %s9_s11  ;;  %s11_s16 = scalar_lea.hbm %s61_s0, 1024 }
   0x3   :  { %p12_p1 = scmp.lt.u32.totalorder %s11_s16, %s9_s11  ;;  %p13_p2 = scmp.lt.u32.totalorder %s9_s11, %s61_s0 }
   0x5   :  { %p14_p3 = por %p13_p2, %p12_p1 }
   0x7   :  { %p15_p4 = pnand %p14_p3, %p10_p0 }
   0x9   :  { %18 = shalt.err (!%p15_p4)  }
   0xa   :  { %s19_s1 = scalar_lea.vmem %s4_s8, 512  ;;  %p24_p6 = scmp.lt.s32.totalorder %s4_s8, %s4_s8 }
   0xb   :  { %p20_p5 = scmp.ne.s32.totalorder %s4_s8, %s19_s1  ;;  %p25_p7 = scmp.lt.s32.totalorder %s19_s1, %s19_s1 }
   0xd   :  { %p26_p8 = por %p25_p7, %p24_p6 }
   0xf   :  { %p27_p9 = pnand %p26_p8, %p20_p5 }
  0x11   :  { %30 = shalt.err (!%p27_p9)  }
  0x12   :  { %6 = dma.hbm_to_vmem [thread:$0]  %s61_s0, 512, %s4_s8, [#allocation0] }
  0x13   :  { %31 = dma.done.wait [#allocation0], 512  }
  0x14   :  { %32 = vsyncadd [#allocation0], 4294966784 }
  0x15   :  { %8 = vsyncpa [#allocation0], 1 }

// kernel: lstm_cell_forward.1
= control target key start
LH: loop header
LB: loop body
LE: loop exit
PB: predicated region body
PF: predicated region fallthrough
CT: control target
= control target key end

     0   :  { %13 = vsyncpa [#allocation4], 0  ;;  %s1636_s0 = inlined_call_operand.vmem [shape: f32[8,128], index: 0, kind: input, shape index: {}, may-alias: {0,8}]   ;;  %s1637_s1 = inlined_call_operand.vmem [shape: bf16[8,2048], index: 1, kind: input, shape index: {}]   ;;  %s1638_s2 = inlined_call_operand.vmem [shape: f32[8,2], index: 2, kind: input, shape index: {}]   ;;  %s1639_s3 = inlined_call_operand.hbm [shape: bf16[2048,128], index: 3, kind: input, shape index: {}]   ;;  %s1640_s4 = inlined_call_operand.vmem [shape: f32[2,128], index: 4, kind: input, shape index: {}]   ;;  %s1641_s5 = inlined_call_operand.vmem [shape: bf16[64,128], index: 5, kind: input, shape index: {}]   ;;  %s1642_s6 = inlined_call_operand.vmem [shape: f32[2,128], index: 6, kind: input, shape index: {}]   ;;  %s1643_s7 = inlined_call_operand.vmem [shape: bf16[32,128], index: 7, kind: input, shape index: {}]   ;;  %s1644_s8 = inlined_call_operand.vmem [shape: f32[8,128], index: 8, kind: output, shape index: {}, may-alias: {0,8}]  }
   0x1   :  { %15 = vsyncpa [#allocation4 + $0x1], 0  ;;  %s1416_s27 = smov 0   ;;  %s1418_s28 = smov 0  }
   0x2   :  { %s1420_s29 = smov 0   ;;  %s1422_s30 = smov 0  }
   0x3 LB: > { %s1435_s9 = sadd.s32 4294967295, %s1358_s30   ;;  %s1438_s10 = sadd.s32 1, %s1358_s30   ;;  %s1358_s30 = sphi %s1422_s30, %s1651_s30   ;;  %s1354_s29 = sphi %s1420_s29, %s1650_s29   ;;  %s1350_s28 = sphi %s1418_s28, %s1649_s28   ;;  %s1346_s27 = sphi %s1416_s27, %s1648_s27  }
   0x4   : > { %s93_s11 = ssub.s32 %s1358_s30, %s1438_s10  ;;  %s96_s12 = sadd.s32 1, %s1354_s29 }
   0x5   : > { %p94_p0 = scmp.eq.s32.totalorder %s93_s11, 0  ;;  %p103_p1 = scmp.ne.s32.totalorder %s1354_s29, %s1350_s28 }
   0x6   : > { %p104_p2 = scmp.eq.s32.totalorder %s1358_s30, 0  ;;  %p109_p3 = scmp.ne.s32.totalorder %s1350_s28, %s1346_s27 }
   0x7   : > { %s1448_s13 = scalar_select %p94_p0, %s1354_s29, %s96_s12  }
   0x8   : > { %p105_p4 = por %p104_p2, %p103_p1  ;;  %p110_p5 = scmp.eq.s32.totalorder %s1435_s9, 0 }
   0x9   : > { %p1191_p6 = scmp.lt.s32.totalorder %s1358_s30, 4  ;;  %s265_s15 = sand.u32 1, %s1354_s29  }
   0xa   : > { %p1452_p7 = por %p110_p5, %p109_p3  ;;  %s1047_s16 = sshll.u32 %s265_s15, 8 }
   0xb   : > { %s1107_s17 = sshll.u32 %s1358_s30, 12  ;;  %s269_s21 = scalar_lea.vmem [#allocation3], %s1047_s16 }
   0xc   : > { %s1461_s20 = scalar_lea.hbm %s1639_s3, %s1107_s17  ;;  %s276_s22 = sshll.u32 %s269_s21, 4  ;;  %s1463_s22 = int_to_ptr.vmem [resolvable:$true] %s276_s22 }
   0xd   : > { %p1465_p8 = pnand %p1191_p6, %p105_p4  ;;  %s1470_s24 = scalar_lea.sflag [#allocation4], %s265_s15 }
   0xe   : > { %s1294_s25 = scalar_lea.hbm %s1461_s20, 4096  ;;  %s1299_s11 = scalar_lea.hbm %s1639_s3, 16384 }
   0xf   : > { %p1295_p10 = scmp.ne.s32.totalorder %s1461_s20, %s1294_s25  ;;  %p1296_p11 = pneg %p1465_p8 }
  0x10   : > { %p1300_p0 = scmp.lt.u32.totalorder %s1461_s20, %s1639_s3  ;;  %p1301_p1 = scmp.lt.u32.totalorder %s1299_s11, %s1294_s25 }
  0x11   : > { %p1297_p12 = pnand %p1296_p11, %p1295_p10  ;;  %p1303_p3 = scmp.lt.u32.totalorder %s1294_s25, %s1461_s20 }
  0x12   : > { %p1302_p2 = por %p1301_p1, %p1300_p0 }
  0x13   : > { %p1298_p13 = pneg %p1297_p12 }
  0x14   : > { %p1304_p4 = por %p1303_p3, %p1302_p2 }
  0x16   : > { %p1305_p5 = pnand %p1304_p4, %p1298_p13 }
  0x18   : > { %1308 = shalt.err (!%p1305_p5)
}
  0x19   : > { %s1309_s15 = scalar_lea.vmem %s1463_s22, 4096  ;;  %s1360_s17 = smov [#allocation3]  }
  0x1a   : > { %p1310_p6 = scmp.ne.s32.totalorder %s1463_s22, %s1309_s15  ;;  %s1314_s18 = sshll.u32 %s1360_s17, 4  ;;  %s1315_s18 = int_to_ptr.vmem [resolvable:$false] %s1314_s18 }
  0x1b   : > { %s1316_s19 = scalar_lea.vmem %s1315_s18, 8192  ;;  %p1317_p9 = scmp.lt.s32.totalorder %s1463_s22, %s1315_s18 }
  0x1c   : > { %p1312_p10 = pnand %p1310_p6, %p1296_p11  ;;  %p1318_p0 = scmp.lt.s32.totalorder %s1316_s19, %s1309_s15 }
  0x1e   : > { %p1313_p12 = pneg %p1312_p10  ;;  %p1319_p1 = por %p1318_p0, %p1317_p9 }
  0x20   : > { %p1320_p2 = pnand %p1319_p1, %p1313_p12 }
  0x22   : > { %1323 = shalt.err (!%p1320_p2)
}
  0x23   : > { %s1361_s21 = smov 64   ;;  %s1362_s25 = smov 4  }
  0x24   : > { %1190 = dma.hbm_to_vmem [thread:$0]  (!%p1465_p8), %s1461_s20, 4096, %s1463_s22, %s1470_s24, %s1361_s21, %s1361_s21, %s1362_s25  }
  0x25   : > { %p284_p11 = scmp.lt.s32.totalorder %s1358_s30, 5  ;;  %p1647_p13 = scmp.ge.s32.totalorder %s1358_s30, 1 }
  0x27   : > { %p285_p3 = pnand %p1647_p13, %p284_p11 }
  0x28   : > { %s290_s26 = sand.u32 (!%p285_p3), 1, %s1350_s28  }
  0x29   : > { %288 = sbr.rel (%p285_p3) target bundleno = 1719 (0x6b7), region = 52  ;;  %s1051_s27 = sshll.u32 (!%p285_p3), %s290_s26, 8 }
  0x2a   : > { %s291_s11 = scalar_lea.sflag (!%p285_p3), [#allocation4], %s290_s26  ;;  %s1502_s12 = scalar_lea.vmem (!%p285_p3), [#allocation3], %s1051_s27 }
  0x30   : > { %1341 = dma.done.wait (%p1452_p7), %s291_s11, 4096  }
  0x31   : > { %1343 = vsyncadd (%p1452_p7), %s291_s11, 4294963200  ;;  %s1052_s16 = sshll.u32 %s1435_s9, 2  ;;  %p1054_p8 = scmp.ne.s32.totalorder %s1435_s9, 0 }
  0x32   : > { %p328_p9 = scmp.lt.s32.totalorder %s1052_s16, 15  ;;  %v1363_v0 = vmov (!%p1054_p8), 0.0  }
  0x33   : > { %338 = sbr.rel (%p1054_p8) target bundleno = 58 (0x3a), region = 60  ;;  %339 = vst [vmem:[#allocation2] sm:$0xff] (!%p1054_p8), %v1363_v0 }
  0x34   : > { %s1653_s16 = smov (!%p328_p9, %s1052_s16), 15 }
  0x35   : > { %s1053_s20 = sshll.u32 %s1653_s16, 2 }
  0x36   : > { %s1512_s23 = scalar_lea.vmem %s1637_s1, %s1053_s20 }
  0x3a PF: > { %v1234_v1 = vld [vmem:[%s1502_s12 + $0x40] sm:$0xff]   ;;  %v1238_v5 = vld [vmem:[%s1502_s12 + $0x48] sm:$0xff]   ;;  %v1242_v9 = vld [vmem:[%s1502_s12 + $0x50] sm:$0xff]   ;;  %p1091_p7 = scmp.ne.s32.totalorder %s1435_s9, 3 }
  0x3b   : > { %v1235_v2 = vld [vmem:[%s1502_s12 + $0xc0] sm:$0xff]   ;;  %1108 = vmatprep.subr.bf16.mxu0 %v1234_v1  ;;  %v1239_v6 = vld [vmem:[%s1502_s12 + $0xc8] sm:$0xff]   ;;  %v1243_v10 = vld [vmem:[%s1502_s12 + $0xd0] sm:$0xff]   ;;  %v1364_v53 = vmov (!%p1091_p7), 0.0   ;;  %vm1365_vm0 = vmmov (!%p1091_p7), 0   ;;  %v1366_v57 = vmov (!%p1091_p7), 0   ;;  %v707_v60 = vlaneseq (!%p1091_p7) }
  0x3c   : > { %v1236_v3 = vld [vmem:[%s1502_s12] sm:$0xff]   ;;  %1130 = vmatprep.subr.bf16.mxu1 %v1235_v2  ;;  %v1240_v7 = vld [vmem:[%s1502_s12 + $0x8] sm:$0xff]   ;;  %v1244_v11 = vld [vmem:[%s1502_s12 + $0x10] sm:$0xff]   ;;  %1270 = vset.pattern.permute.xlu0 (!%p1091_p7), %v1366_v57  ;;  %vm741_vm1 = vcmask (!%p1091_p7), 261120   ;;  %v1367_v59 = vmov (!%p1091_p7), 1   ;;  %s1368_s25 = smov (!%p1091_p7), 64  }
  0x3d   : > { %v1237_v4 = vld [vmem:[%s1502_s12 + $0x80] sm:$0xff]   ;;  %1109 = vmatpush3.bf16.msra.mxu0 %v1236_v3  ;;  %v1241_v8 = vld [vmem:[%s1502_s12 + $0x88] sm:$0xff]   ;;  %v1245_v12 = vld [vmem:[%s1502_s12 + $0x90] sm:$0xff]   ;;  %v708_v61 = vshrl.u32 (!%p1091_p7), %v707_v60, 7  ;;  %s1369_s16 = smov (!%p1091_p7), 32   ;;  %s1370_s19 = smov (!%p1091_p7), 96  }
  0x3e   : > { %1131 = vmatpush3.bf16.msra.mxu1 %v1237_v4  ;;  %1110 = vmatprep.subr.bf16.mxu0 %v1238_v5  ;;  %v1246_v13 = vld [vmem:[%s1502_s12 + $0x58] sm:$0xff]   ;;  %v1250_v17 = vld [vmem:[%s1502_s12 + $0x60] sm:$0xff]   ;;  %v1254_v21 = vld [vmem:[%s1502_s12 + $0x68] sm:$0xff]   ;;  %vm988_vm2 = vcmask (!%p1091_p7), 523264   ;;  %vm990_vm3 = vcmask (!%p1091_p7), 785408  }
  0x3f   : > { %1132 = vmatprep.subr.bf16.mxu1 %v1239_v6  ;;  %v1247_v14 = vld [vmem:[%s1502_s12 + $0xd8] sm:$0xff]   ;;  %v1251_v18 = vld [vmem:[%s1502_s12 + $0xe0] sm:$0xff]   ;;  %v1255_v22 = vld [vmem:[%s1502_s12 + $0xe8] sm:$0xff]   ;;  %v709_v62 = vsub.s32 (!%p1091_p7), 0, %v708_v61  ;;  %v719_v2 = vsub.s32 (!%p1091_p7), 1, %v708_v61 }
  0x40   : > { %v1248_v15 = vld [vmem:[%s1502_s12 + $0x18] sm:$0xff]   ;;  %v1252_v19 = vld [vmem:[%s1502_s12 + $0x20] sm:$0xff]   ;;  %v1256_v23 = vld [vmem:[%s1502_s12 + $0x28] sm:$0xff]  }
  0x41   : > { %1111 = vmatpush3.bf16.msra.mxu0 %v1240_v7  ;;  %v1249_v16 = vld [vmem:[%s1502_s12 + $0x98] sm:$0xff]   ;;  %v1253_v20 = vld [vmem:[%s1502_s12 + $0xa0] sm:$0xff]   ;;  %v1257_v24 = vld [vmem:[%s1502_s12 + $0xa8] sm:$0xff]  }
  0x42   : > { %1133 = vmatpush3.bf16.msra.mxu1 %v1241_v8  ;;  %1112 = vmatprep.subr.bf16.mxu0 %v1242_v9  ;;  %v1258_v25 = vld [vmem:[%s1502_s12 + $0x70] sm:$0xff]   ;;  %v1262_v29 = vld [vmem:[%s1502_s12 + $0x78] sm:$0xff]   ;;  %v342_v34 = vld [vmem:[%s1512_s23 + $0x8] sm:$0xff] }
  0x43   : > { %1134 = vmatprep.subr.bf16.mxu1 %v1243_v10  ;;  %v1259_v26 = vld [vmem:[%s1502_s12 + $0xf0] sm:$0xff]   ;;  %v1263_v30 = vld [vmem:[%s1502_s12 + $0xf8] sm:$0xff]   ;;  %v1057_v37 = vcombine.low %v342_v34, %v342_v34  ;;  %v1058_v38 = vcombine.high %v342_v34, %v342_v34  ;;  %v1273_v54 = vld [vmem:[%s1641_s5 + $0x8] sm:$0xff] (!%p1091_p7)  }
  0x44   : > { %v1260_v27 = vld [vmem:[%s1502_s12 + $0x30] sm:$0xff]   ;;  %v1264_v31 = vld [vmem:[%s1502_s12 + $0x38] sm:$0xff]  }
  0x45   : > { %1113 = vmatpush3.bf16.msra.mxu0 %v1244_v11  ;;  %v1261_v28 = vld [vmem:[%s1502_s12 + $0xb0] sm:$0xff]   ;;  %v1265_v32 = vld [vmem:[%s1502_s12 + $0xb8] sm:$0xff]   ;;  %685 = vmatprep.mubr.bf16.mxu1 %v1058_v38 }
  0x46   : > { %1135 = vmatpush3.bf16.msra.mxu1 %v1245_v12  ;;  %1114 = vmatprep.subr.bf16.mxu0 %v1246_v13  ;;  %v341_v33 = vld [vmem:[%s1512_s23] sm:$0xff] }
  0x47   : > { %1136 = vmatprep.subr.bf16.mxu1 %v1247_v14  ;;  %v1055_v35 = vcombine.low %v341_v33, %v341_v33  ;;  %v1056_v36 = vcombine.high %v341_v33, %v341_v33  ;;  %v340_v47 = vld [vmem:[#allocation2] sm:$0xff] }
  0x48   : > { %v1272_v52 = vld [vmem:[%s1641_s5] sm:$0xff] (!%p1091_p7)  }
  0x49   : > { %1115 = vmatpush3.bf16.msra.mxu0 %v1248_v15  ;;  %645 = vmatprep.mubr.bf16.mxu0 %v1056_v36  ;;  %v1563_v55 = vld [vmem:[%s1636_s0] sm:$0xff] (!%p1091_p7) }
  0x4a   : > { %1137 = vmatpush3.bf16.msra.mxu1 %v1249_v16  ;;  %1116 = vmatprep.subr.bf16.mxu0 %v1250_v17  ;;  %v699_v56 = vld [vmem:[%s1638_s2] sm:$0xff] (!%p1091_p7)  ;;  %v724_v58 = vpack.c.bf16 (!%p1091_p7), %v1563_v55, %v1563_v55 }
  0x4b   : > { %1138 = vmatprep.subr.bf16.mxu1 %v1251_v18  ;;  %704 = vperm.xlu0 (!%p1091_p7), %1270, %v699_v56   ;;  %v700_v63 = vld [vmem:[%s1640_s4] sm:$0x3] (!%p1091_p7) }
  0x4c   : > { %v710_v1 = vrot.slane (!%p1091_p7), %v700_v63, %v709_v62  ;;  %v720_v4 = vrot.slane (!%p1091_p7), %v700_v63, %v719_v2  ;;  %v1095_v11 = vld [vmem:[%s1642_s6] ss:$0 sm:$0xff] (!%p1091_p7) }
  0x4d   : > { %1117 = vmatpush3.bf16.msra.mxu0 %v1252_v19 }
  0x4e   : > { %1139 = vmatpush3.bf16.msra.mxu1 %v1253_v20  ;;  %1118 = vmatprep.subr.bf16.mxu0 %v1254_v21 }
  0x4f   : > { %1140 = vmatprep.subr.bf16.mxu1 %v1255_v22  ;;  %1271 = vset.pattern.permute.xlu0 (!%p1091_p7), %v1367_v59 }
  0x50   : > { %714 = vperm.xlu0 (!%p1091_p7), %1271, %v699_v56  }
  0x51   : > { %1119 = vmatpush3.bf16.msra.mxu0 %v1256_v23 }
  0x52   : > { %1141 = vmatpush3.bf16.msra.mxu1 %v1257_v24  ;;  %1120 = vmatprep.subr.bf16.mxu0 %v1258_v25 }
  0x53   : > { %1142 = vmatprep.subr.bf16.mxu1 %v1259_v26 }
  0x54   : > { %826 = vrot.lane.b32.xlu0 (!%p1091_p7), %v724_v58, %s1368_s25 }
  0x55   : > { %1121 = vmatpush3.bf16.msra.mxu0 %v1260_v27  ;;  %v1274_v27 = vld [vmem:[%s1641_s5 + $0x10] sm:$0xff] (!%p1091_p7)  }
  0x56   : > { %1143 = vmatpush3.bf16.msra.mxu1 %v1261_v28  ;;  %1122 = vmatprep.subr.bf16.mxu0 %v1262_v29  ;;  %v1275_v28 = vld [vmem:[%s1643_s7] sm:$0xff] (!%p1091_p7)   ;;  %v1276_v29 = vld [vmem:[%s1641_s5 + $0x18] sm:$0xff] (!%p1091_p7)  }
  0x57   : > { %1144 = vmatprep.subr.bf16.mxu1 %v1263_v30  ;;  %v1277_v30 = vld [vmem:[%s1643_s7 + $0x8] sm:$0xff] (!%p1091_p7)  }
  0x59   : > { %1123 = vmatpush3.bf16.msra.mxu0 %v1264_v31 }
  0x5a   : > { %1145 = vmatpush3.bf16.msra.mxu1 %v1265_v32  ;;  %1161 = vmatprep.subr.bf16.mxu0 (!%p1091_p7), %v1364_v53 }
  0x5b   : > { %1169 = vmatprep.subr.bf16.mxu1 (!%p1091_p7), %v1364_v53 }
  0x5c   : > { %646 = vmatmul.mubr.bf16.vlgmr.msra.gmra.mrb[0].mxu0 %v1055_v35 }
  0x5d   : > { %686 = vmatmul.mubr.bf16.vlgmr.msra.gmra.mrb[0].mxu1 %v1057_v37  ;;  %1162 = vmatpush3.bf16.msra.mxu0 (!%p1091_p7), %v1272_v52 }
  0x5e   : > { %1165 = vmatprep.mubr.msk.bf16.mxu0 (!%p1091_p7), %vm1365_vm0, %v1364_v53  ;;  %1163 = vmatprep.subr.bf16.mxu0 (!%p1091_p7), %v1364_v53 }
  0x5f   : > { %1173 = vmatprep.mubr.msk.bf16.mxu1 (!%p1091_p7), %vm1365_vm0, %v1364_v53  ;;  %1170 = vmatpush3.bf16.msra.mxu1 (!%p1091_p7), %v1274_v27 }
  0x60   : > { %1171 = vmatprep.subr.bf16.mxu1 (!%p1091_p7), %v1364_v53 }
  0x61   : > { %1164 = vmatpush3.bf16.msra.mxu0 (!%p1091_p7), %v1273_v54 }
  0x62   : > { %1177 = vmatprep.subr.bf16.mxu0 (!%p1091_p7), %v1364_v53 }
  0x63   : > { %1172 = vmatpush3.bf16.msra.mxu1 (!%p1091_p7), %v1276_v29 }
  0xca   : > { %v705_v0 = vpop.permute.xlu0 (!%p1091_p7), %704 }
  0xcb   : > { %v711_v3 = vmul.f32 (!%p1091_p7), %v710_v1, %v705_v0 }
  0xcf   : > { %v715_v6 = vpop.permute.xlu0 (!%p1091_p7), %714 }
  0xd0   : > { %v721_v8 = vmul.f32 (!%p1091_p7), %v720_v4, %v715_v6 }
  0xd3   : > { %v827_v31 = vpop.permute.xlu0 (!%p1091_p7), %826 }
 0x12f   : > { %v1124_v39 = vpop.f32.mrb[0].mxu0 }
 0x130   : > { %v1146_v40 = vpop.f32.mrb[0].mxu1  ;;  %v1125_v41 = vpop.f32.mrb[1].mxu0 }
 0x131   : > { %v1147_v42 = vpop.f32.mrb[1].mxu1  ;;  %v1126_v43 = vadd.f32 %v1125_v41, %v1124_v39  ;;  %v1127_v45 = vpop.f32.mrb[2].mxu0 }
 0x132   : > { %v1148_v44 = vadd.f32 %v1147_v42, %v1146_v40  ;;  %v1149_v46 = vpop.f32.mrb[2].mxu1  ;;  %v1128_v48 = vpop.f32.mrb[3].mxu0  ;;  %698 = sbr.rel (%p1091_p7) target bundleno = 1719 (0x6b7), region = 64  ;;  %1166 = vmatmul.mubr.msk.bf16.vlgmr.msra.gmra.mrb[0].mxu0 (!%p1091_p7), %vm741_vm1, %v724_v58  ;;  %v1103_v42 = vld [vmem:[%s1642_s6 + $0x1] ss:$0 sm:$0xff] (!%p1091_p7) }
 0x133   : > { %v1150_v49 = vpop.f32.mrb[3].mxu1  ;;  %1181 = vmatprep.mubr.msk.bf16.mxu0 (!%p1091_p7), %vm1365_vm0, %v1364_v53  ;;  %1178 = vmatpush3.bf16.msra.mxu0 (!%p1091_p7), %v1275_v28 }
 0x134   : > { %v688_v50 = vadd.f32 %v1148_v44, %v1126_v43  ;;  %1179 = vmatprep.subr.bf16.mxu0 (!%p1091_p7), %v1364_v53  ;;  %1174 = vmatmul.mubr.msk.bf16.vlgmr.msra.gmra.mrb[0].mxu1 (!%p1091_p7), %vm741_vm1, %v827_v31 }
 0x136   : > { %v693_v51 = vadd.f32 %v688_v50, %v340_v47 }
 0x137   : > { %1180 = vmatpush3.bf16.msra.mxu0 (!%p1091_p7), %v1277_v30 }
 0x138   : > { %694 = vst [vmem:[#allocation2] sm:$0xff] %v693_v51 }
 0x13f   : > { %v701_v5 = vld [vmem:[#allocation2] sm:$0xff] }
 0x140   : > { %v712_v7 = vadd.f32 %v711_v3, %v701_v5 }
 0x142   : > { %v722_v9 = vadd.f32 %v721_v8, %v712_v7 }
 0x205   : > { %v779_v10 = vpop.f32.mrb[0].mxu0 }
 0x206   : > { %v785_v12 = vadd.f32 %v779_v10, %v722_v9  ;;  %v1167_v13 = vpop.f32.mrb[1].mxu0 }
 0x207   : > { %v782_v14 = vpop.f32.mrb[2].mxu0  ;;  %v877_v36 = vpop.f32.mrb[0].mxu1 }
 0x208   : > { %v791_v15 = vadd.f32 %v1095_v11, %v785_v12  ;;  %v1168_v16 = vpop.f32.mrb[3].mxu0  ;;  %v1175_v37 = vpop.f32.mrb[1].mxu1 }
 0x209   : > { %v880_v38 = vpop.f32.mrb[2].mxu1 }
 0x20a   : > { %1278 = vtanh.f32 %v791_v15  ;;  %v1096_v18 = vmul.f32 -1.442695, %v791_v15  ;;  %v1176_v39 = vpop.f32.mrb[3].mxu1 }
 0x20c   : > { %1280 = vpow2.f32 %v1096_v18 }
 0x214   : > { %v1279_v17 = vpop.eup %1278 }
 0x215   : > { %801 = vrot.lane.b32.xlu1 %v1279_v17, %s1368_s25 }
 0x216   : > { %v1281_v19 = vpop.eup %1280 }
 0x217   : > { %v795_v20 = vadd.f32 1.0, %v1281_v19 }
 0x219   : > { %1282 = vrcp.f32 %v795_v20 }
 0x223   : > { %v1283_v21 = vpop.eup %1282 }
 0x224   : > { %v799_v24 = vmul.f32 %v1283_v21, %v1563_v55 }
 0x287   : > { %v802_v22 = vpop.permute.xlu1 %801 }
 0x288   : > { %v804_v23 = vmul.f32 %v1283_v21, %v802_v22 }
 0x28a   : > { %806 = vrot.lane.b32.xlu1 %v804_v23, %s1369_s16 }
 0x2fc   : > { %v807_v25 = vpop.permute.xlu1 %806 }
 0x2fd   : > { %v1587_v26 = vadd.f32 %v807_v25, %v799_v24 }
 0x2ff   : > { %1284 = vtanh.f32 %v1587_v26 }
 0x309   : > { %v1285_v32 = vpop.eup %1284 }
 0x30a   : > { %812 = vrot.lane.b32.xlu1 %v1285_v32, %s1368_s25 }
 0x37c   : > { %v813_v33 = vpop.permute.xlu1 %812 }
 0x37d   : > { %v815_v34 = vmul.f32 %v1283_v21, %v813_v33 }
 0x37f   : > { %v816_v35 = vpack.c.bf16 %v815_v34, %v815_v34 }
 0x381   : > { %884 = vrot.lane.b32.xlu1 %v816_v35, %s1369_s16 }
 0x385   : > { %955 = vrot.lane.b32.xlu1 %v1563_v55, %s1368_s25 }
 0x3f3   : > { %v885_v40 = vpop.permute.xlu1 %884 }
 0x3f4   : > { %1182 = vmatmul.mubr.msk.bf16.vlgmr.msra.gmra.mrb[4].mxu0 %vm741_vm1, %v885_v40 }
 0x3f7   : > { %v956_v55 = vpop.permute.xlu1 %955 }
 0x4c7   : > { %v935_v41 = vpop.f32.mrb[4].mxu0 }
 0x4c8   : > { %v936_v43 = vadd.f32 %v935_v41, %v877_v36  ;;  %v1183_v44 = vpop.f32.mrb[5].mxu0 }
 0x4c9   : > { %v938_v45 = vpop.f32.mrb[6].mxu0 }
 0x4ca   : > { %v946_v46 = vadd.f32 %v1103_v42, %v936_v43  ;;  %v1184_v47 = vpop.f32.mrb[7].mxu0 }
 0x4cc   : > { %1286 = vtanh.f32 %v946_v46  ;;  %v1104_v49 = vmul.f32 -1.442695, %v946_v46 }
 0x4ce   : > { %1288 = vpow2.f32 %v1104_v49 }
 0x4d6   : > { %v1287_v48 = vpop.eup %1286 }
 0x4d7   : > { %960 = vrot.lane.b32.xlu0 %v1287_v48, %s1368_s25 }
 0x4d8   : > { %v1289_v50 = vpop.eup %1288 }
 0x4d9   : > { %v950_v51 = vadd.f32 1.0, %v1289_v50 }
 0x4db   : > { %1290 = vrcp.f32 %v950_v51 }
 0x4e5   : > { %v1291_v52 = vpop.eup %1290 }
 0x4e6   : > { %v958_v56 = vmul.f32 %v1291_v52, %v956_v55 }
 0x549   : > { %v961_v53 = vpop.permute.xlu0 %960 }
 0x54a   : > { %v963_v54 = vmul.f32 %v1291_v52, %v961_v53 }
 0x54c   : > { %965 = vrot.lane.b32.xlu0 %v963_v54, %s1369_s16 }
 0x550   : > { %976 = vrot.lane.b32.xlu0 %v815_v34, %s1369_s16 }
 0x5be   : > { %v966_v57 = vpop.permute.xlu0 %965 }
 0x5bf   : > { %v968_v58 = vadd.f32 %v966_v57, %v958_v56 }
 0x5c1   : > { %1292 = vtanh.f32 %v968_v58  ;;  %984 = vrot.lane.b32.xlu0 %v968_v58, %s1368_s25 }
 0x5c2   : > { %v977_v62 = vpop.permute.xlu0 %976 }
 0x5c3   : > { %v987_v63 = vsel %vm741_vm1, %v977_v62, %v1587_v26 }
 0x5cb   : > { %v1293_v59 = vpop.eup %1292 }
 0x5cc   : > { %971 = vrot.lane.b32.xlu1 %v1293_v59, %s1368_s25 }
 0x633   : > { %v985_v1 = vpop.permute.xlu0 %984 }
 0x63e   : > { %v972_v60 = vpop.permute.xlu1 %971 }
 0x63f   : > { %v974_v61 = vmul.f32 %v1291_v52, %v972_v60 }
 0x641   : > { %980 = vrot.lane.b32.xlu1 %v974_v61, %s1370_s19 }
 0x6b3   : > { %v981_v0 = vpop.permute.xlu1 %980 }
 0x6b4   : > { %v989_v2 = vsel %vm988_vm2, %v987_v63, %v981_v0 }
 0x6b5   : > { %v991_v3 = vsel %vm990_vm3, %v989_v2, %v985_v1 }
 0x6b6   : > { %992 = vst [vmem:[%s1644_s8] sm:$0xff] %v991_v3 }
 0x6b7 PF: > { %p18_p4 = scmp.ge.s32.totalorder %s1438_s10, 6   ;;  %s1648_s27 = smov %s1350_s28 }
 0x6b8   : > { %s1649_s28 = smov %s1354_s29  ;;  %s1650_s29 = smov %s1448_s13 }
 0x6b9   : > { %s1651_s30 = smov %s1438_s10  ;;  %20 = sbr.rel (!%p18_p4) target bundleno = 3 (0x3), region = 99 }
 0x6c0   :  { %1004 = vsyncpa [#allocation4], 1 }
 0x6c1   :  { %1006 = vsyncpa [#allocation4 + $0x1], 1 }

</bundles_post_ra>
